<compile_context>
chip_gen: v6e
topology: v6e:2x2x1
jax: 0.10.0
libtpu: 0.0.40
codegen_flags: <defaults>
</compile_context>

<pallas_src>
import functools

import jax
import jax.numpy as jnp
from jax.experimental import pallas as pl
from jax.experimental.pallas import tpu as pltpu


# ----------------------------- tiling helper -------------------------------- #

def _pick_tile_h(h_out, w_out, target=8):
    """Largest divisor of h_out <= target with sublane-aligned (tile_h * w_out)."""
    for d in range(min(target, h_out), 0, -1):
        if h_out % d == 0 and (d * w_out) % 8 == 0:
            return d
    return h_out  # whole-extent block (always legal: equals the full dim)


# ----------------------------- Pallas kernels ------------------------------- #

def _conv3x3_prelu_s1_kernel(x_ref, h0_ref, h1_ref, w_ref, b_ref, a_ref, o_ref,
                             *, tile_h, w_out):
    # x_ref : (tile_h, Wp, Cin)  main row tile of the padded input
    # h0/h1 : (Wp, Cin)          the two halo rows below the tile
    # w_ref : (9*Cin, Cout)      im2col weights (dy, dx, ci) row order
    # b_ref : (1, Cout)          bias
    # a_ref : (1,) in SMEM       PReLU alpha (single shared parameter)
    # o_ref : (tile_h*w_out, Cout)
    c_in = x_ref.shape[-1]
    slab = jnp.concatenate(
        [x_ref[...], h0_ref[...][None], h1_ref[...][None]], axis=0)   # (tile_h+2, Wp, Cin)
    # im2col: 9 shifted windows concatenated along the channel (lane) axis.
    taps = [slab[dy:dy + tile_h, dx:dx + w_out, :]
            for dy in range(3) for dx in range(3)]
    patches = jnp.concatenate(taps, axis=-1)                  # (tile_h, w_out, 9*Cin)
    patches = patches.reshape(tile_h * w_out, 9 * c_in)
    acc = jnp.dot(patches, w_ref[...], preferred_element_type=jnp.float32)
    acc = acc + b_ref[...]                                    # (1, Cout) broadcast
    alpha = a_ref[0]
    o_ref[...] = jnp.where(acc >= 0.0, acc, alpha * acc).astype(o_ref.dtype)


def _conv3x3_prelu_s2_kernel(x_ref, h_ref, w_ref, b_ref, a_ref, o_ref,
                             *, tile_h, w_out):
    # Stride-2 conv.  Input view is (tile_h, 2, Wq, 2*Cin): the H-parity is a major
    # dim (plain slice); the W-parity rides along the channel axis and is resolved by
    # zero-padded weights inside the single im2col matmul (K = 12*Cin).
    # x_ref : (tile_h, 2, Wq, 2*Cin)   main Hq row tile
    # h_ref : (2, Wq, 2*Cin)           one halo Hq row
    # w_ref : (12*Cin, Cout)
    c2 = x_ref.shape[-1]                                      # 2 * Cin
    slab = jnp.concatenate([x_ref[...], h_ref[...][None]], axis=0)  # (tile_h+1, 2, Wq, 2Cin)
    taps = [slab[dy // 2: dy // 2 + tile_h, dy % 2, dxq: dxq + w_out, :]
            for dy in range(3) for dxq in range(2)]
    patches = jnp.concatenate(taps, axis=-1)                  # (tile_h, w_out, 6*2Cin)
    patches = patches.reshape(tile_h * w_out, 6 * c2)
    acc = jnp.dot(patches, w_ref[...], preferred_element_type=jnp.float32)
    acc = acc + b_ref[...]
    alpha = a_ref[0]
    o_ref[...] = jnp.where(acc >= 0.0, acc, alpha * acc).astype(o_ref.dtype)


# ------------------------------ conv wrapper -------------------------------- #

def conv3x3_prelu(x_nhwc, w, b, alpha, stride):
    """Fused Conv2d(3x3, stride, padding=1, bias=True) + PReLU.  x_nhwc: (N,H,W,Cin)."""
    assert stride in (1, 2)
    N, H, W, Cin = x_nhwc.shape
    Cout = w.shape[-1]
    Hout = (H - 1) // stride + 1
    Wout = (W - 1) // stride + 1

    # zero pad: 1 at top/left (PyTorch padding=1); pad bottom/right so the padded
    # extent is exactly stride*out + 2 (extra zero rows/cols are never used).
    Hp = stride * Hout + 2
    Wp = stride * Wout + 2
    xp = jnp.pad(x_nhwc, ((0, 0), (1, Hp - 1 - H), (1, Wp - 1 - W), (0, 0)))

    tile_h = _pick_tile_h(Hout, Wout)
    n_tiles = Hout // tile_h

    b2 = b.reshape(1, Cout).astype(jnp.float32)
    a1 = jnp.asarray(alpha, jnp.float32).reshape(1)

    if stride == 1:
        wmat = w.astype(jnp.float32).reshape(9 * Cin, Cout)
        kernel = functools.partial(_conv3x3_prelu_s1_kernel, tile_h=tile_h, w_out=Wout)
        x_specs = [
            # main row tile
            pl.BlockSpec((None, tile_h, Wp, Cin), lambda n, t: (n, t, 0, 0)),
            # two halo rows, delivered as single-row blocks of the same HBM array
            pl.BlockSpec((None, None, Wp, Cin),
                         lambda n, t: (n, t * tile_h + tile_h, 0, 0)),
            pl.BlockSpec((None, None, Wp, Cin),
                         lambda n, t: (n, t * tile_h + tile_h + 1, 0, 0)),
        ]
        x_args = (xp, xp, xp)
    else:
        # free reshape view (no HBM round trip, no transpose):
        #   xp (N, 2*Hout+2, 2*Wout+2, Cin) -> (N, Hq, 2, Wq, 2*Cin)
        Hq, Wq = Hout + 1, Wout + 1
        xv = xp.reshape(N, Hq, 2, Wq, 2 * Cin)
        # weights with the W-parity folded into the contraction; dx=3 column is zero.
        w4 = jnp.pad(w.astype(jnp.float32), ((0, 0), (0, 1), (0, 0), (0, 0)))
        wmat = w4.reshape(12 * Cin, Cout)
        kernel = functools.partial(_conv3x3_prelu_s2_kernel, tile_h=tile_h, w_out=Wout)
        x_specs = [
            pl.BlockSpec((None, tile_h, 2, Wq, 2 * Cin),
                         lambda n, t: (n, t, 0, 0, 0)),
            pl.BlockSpec((None, None, 2, Wq, 2 * Cin),
                         lambda n, t: (n, t * tile_h + tile_h, 0, 0, 0)),
        ]
        x_args = (xv, xv)

    out = pl.pallas_call(
        kernel,
        out_shape=jax.ShapeDtypeStruct((N, Hout * Wout, Cout), jnp.float32),
        grid=(N, n_tiles),
        in_specs=x_specs + [
            pl.BlockSpec(wmat.shape, lambda n, t: (0, 0)),
            pl.BlockSpec((1, Cout), lambda n, t: (0, 0)),
            pl.BlockSpec(memory_space=pltpu.MemorySpace.SMEM),   # PReLU alpha scalar
        ],
        out_specs=pl.BlockSpec((None, tile_h * Wout, Cout), lambda n, t: (n, t, 0)),
        compiler_params=pltpu.CompilerParams(
            dimension_semantics=("parallel", "parallel")),
    )(*x_args, wmat, b2, a1)

    # (N, Hout*Wout, Cout) and (N, Hout, Wout, Cout) are the same bytes (free view).
    return out.reshape(N, Hout, Wout, Cout)


# ------------------------- Parameter initialization ------------------------- #

def init_backbone_params(key, hidden_channels):
    """Deterministic synthetic params. Each FeatBlock: (conv1, prelu1, conv2, prelu2)."""
    params = []
    for cin, cout in zip(hidden_channels[:-1], hidden_channels[1:]):
        stride = 1 if cin == 3 else 2
        key, k1, k2, k3, k4 = jax.random.split(key, 5)
        blk = dict(
            stride=stride,
            w1=0.1 * jax.random.normal(k1, (3, 3, cin, cout), jnp.float32),   # HWIO
            b1=0.05 * jax.random.normal(k2, (cout,), jnp.float32),
            a1=jnp.float32(0.25),    # nn.PReLU() default single parameter
            w2=0.1 * jax.random.normal(k3, (3, 3, cout, cout), jnp.float32),
            b2=0.05 * jax.random.normal(k4, (cout,), jnp.float32),
            a2=jnp.float32(0.25),
        )
        params.append(blk)
    return params


# ------------------------------ Backbone forward ----------------------------- #

def backbone_forward(params, x_nchw):
    """Matches PyTorch Backbone.forward: returns list of NCHW feature maps."""
    x = jnp.transpose(x_nchw, (0, 2, 3, 1))   # NCHW -> NHWC
    feats = []
    for blk in params:
        x = conv3x3_prelu(x, blk["w1"], blk["b1"], blk["a1"], blk["stride"])
        x = conv3x3_prelu(x, blk["w2"], blk["b2"], blk["a2"], 1)
        feats.append(jnp.transpose(x, (0, 3, 1, 2)))  # back to NCHW
    return feats


# ------------------------------- Reference ----------------------------------- #

def _conv3x3_prelu_ref(x_nhwc, w, b, alpha, stride):
    y = jax.lax.conv_general_dilated(
        x_nhwc, w, (stride, stride), ((1, 1), (1, 1)),
        dimension_numbers=("NHWC", "HWIO", "NHWC"),
    )
    y = y + b.reshape(1, 1, 1, -1)
    return jnp.where(y >= 0, y, alpha * y)


def backbone_forward_ref(params, x_nchw):
    x = jnp.transpose(x_nchw, (0, 2, 3, 1))
    feats = []
    for blk in params:
        x = _conv3x3_prelu_ref(x, blk["w1"], blk["b1"], blk["a1"], blk["stride"])
        x = _conv3x3_prelu_ref(x, blk["w2"], blk["b2"], blk["a2"], 1)
        feats.append(jnp.transpose(x, (0, 3, 1, 2)))
    return feats


# ---------------------------------- Main ------------------------------------- #

if __name__ == "__main__":
    key = jax.random.PRNGKey(0)
    k_x, k_p = jax.random.split(key)

    # hidden_channels: first cin == 3 -> stride 1, subsequent blocks stride 2
    hidden_channels = [3, 8, 16]
    x = jax.random.normal(k_x, (2, 3, 16, 16), jnp.float32)   # NCHW like PyTorch

    params = init_backbone_params(k_p, hidden_channels)

    feats = backbone_forward(params, x)
    feats = [jax.block_until_ready(f) for f in feats]

    # sanity check against plain-JAX reference conv
    feats_ref = backbone_forward_ref(params, x)
    for f, fr in zip(feats, feats_ref):
        assert f.shape == fr.shape, (f.shape, fr.shape)
        assert jnp.allclose(f, fr, rtol=1e-4, atol=1e-4), "mismatch vs reference"

    # expected shapes: block0 stride1 -> (2, 8, 16, 16); block1 stride2 -> (2, 16, 8, 8)
    assert feats[0].shape == (2, 8, 16, 16)
    assert feats[1].shape == (2, 16, 8, 8)

    print("KERNEL_OK")
</pallas_src>

<mosaic_0001>
module attributes {stable_mosaic.version = 11 : i64} {
  func.func @_conv3x3_prelu_s1_kernel(%arg0: i32, %arg1: i32, %arg2: memref<1x8x18x3xf32, #tpu.memory_space<vmem>>, %arg3: memref<1x1x18x3xf32, #tpu.memory_space<vmem>>, %arg4: memref<1x1x18x3xf32, #tpu.memory_space<vmem>>, %arg5: memref<27x8xf32, #tpu.memory_space<vmem>>, %arg6: memref<1x8xf32, #tpu.memory_space<vmem>>, %arg7: memref<1xf32, #tpu.memory_space<smem>>, %arg8: memref<1x128x8xf32, #tpu.memory_space<vmem>>) attributes {dimension_semantics = [#tpu.dimension_semantics<parallel>, #tpu.dimension_semantics<parallel>], iteration_bounds = array<i64: 2, 2>, scalar_prefetch = 0 : i64, scratch_operands = 0 : i64, tpu.core_type = #tpu.core_type<tc>, window_params = [{transform_indices = @transform_0, window_bounds = array<i64: 1, 8, 18, 3>}, {transform_indices = @transform_1, window_bounds = array<i64: 1, 1, 18, 3>}, {transform_indices = @transform_2, window_bounds = array<i64: 1, 1, 18, 3>}, {pipeline_mode = #tpu.pipeline_mode<synchronous>, transform_indices = @transform_3, window_bounds = array<i64: 27, 8>}, {pipeline_mode = #tpu.pipeline_mode<synchronous>, transform_indices = @transform_4, window_bounds = array<i64: 1, 8>}, {transform_indices = @transform_5, window_bounds = array<i64: 1>}, {transform_indices = @transform_6, window_bounds = array<i64: 1, 128, 8>}]} {
    %c0 = arith.constant 0 : index
    %c0_0 = arith.constant 0 : index
    %c0_1 = arith.constant 0 : index
    %c0_2 = arith.constant 0 : index
    %0 = vector.load %arg2[%c0, %c0_0, %c0_1, %c0_2] : memref<1x8x18x3xf32, #tpu.memory_space<vmem>>, vector<1x8x18x3xf32>
    %1 = vector.shape_cast %0 : vector<1x8x18x3xf32> to vector<8x18x3xf32>
    %c0_3 = arith.constant 0 : index
    %c0_4 = arith.constant 0 : index
    %c0_5 = arith.constant 0 : index
    %c0_6 = arith.constant 0 : index
    %2 = vector.load %arg3[%c0_3, %c0_4, %c0_5, %c0_6] : memref<1x1x18x3xf32, #tpu.memory_space<vmem>>, vector<1x1x18x3xf32>
    %3 = vector.shape_cast %2 : vector<1x1x18x3xf32> to vector<18x3xf32>
    %4 = vector.shape_cast %3 : vector<18x3xf32> to vector<1x18x3xf32>
    %c0_7 = arith.constant 0 : index
    %c0_8 = arith.constant 0 : index
    %c0_9 = arith.constant 0 : index
    %c0_10 = arith.constant 0 : index
    %5 = vector.load %arg4[%c0_7, %c0_8, %c0_9, %c0_10] : memref<1x1x18x3xf32, #tpu.memory_space<vmem>>, vector<1x1x18x3xf32>
    %6 = vector.shape_cast %5 : vector<1x1x18x3xf32> to vector<18x3xf32>
    %7 = vector.shape_cast %6 : vector<18x3xf32> to vector<1x18x3xf32>
    %8 = tpu.concatenate %1, %4, %7 in 0 : vector<8x18x3xf32>, vector<1x18x3xf32>, vector<1x18x3xf32> -> vector<10x18x3xf32>
    %9 = vector.extract_strided_slice %8 {offsets = [0, 0, 0], sizes = [8, 16, 3], strides = [1, 1, 1]} : vector<10x18x3xf32> to vector<8x16x3xf32>
    %10 = vector.extract_strided_slice %8 {offsets = [0, 1, 0], sizes = [8, 16, 3], strides = [1, 1, 1]} : vector<10x18x3xf32> to vector<8x16x3xf32>
    %11 = vector.extract_strided_slice %8 {offsets = [0, 2, 0], sizes = [8, 16, 3], strides = [1, 1, 1]} : vector<10x18x3xf32> to vector<8x16x3xf32>
    %12 = vector.extract_strided_slice %8 {offsets = [1, 0, 0], sizes = [8, 16, 3], strides = [1, 1, 1]} : vector<10x18x3xf32> to vector<8x16x3xf32>
    %13 = vector.extract_strided_slice %8 {offsets = [1, 1, 0], sizes = [8, 16, 3], strides = [1, 1, 1]} : vector<10x18x3xf32> to vector<8x16x3xf32>
    %14 = vector.extract_strided_slice %8 {offsets = [1, 2, 0], sizes = [8, 16, 3], strides = [1, 1, 1]} : vector<10x18x3xf32> to vector<8x16x3xf32>
    %15 = vector.extract_strided_slice %8 {offsets = [2, 0, 0], sizes = [8, 16, 3], strides = [1, 1, 1]} : vector<10x18x3xf32> to vector<8x16x3xf32>
    %16 = vector.extract_strided_slice %8 {offsets = [2, 1, 0], sizes = [8, 16, 3], strides = [1, 1, 1]} : vector<10x18x3xf32> to vector<8x16x3xf32>
    %17 = vector.extract_strided_slice %8 {offsets = [2, 2, 0], sizes = [8, 16, 3], strides = [1, 1, 1]} : vector<10x18x3xf32> to vector<8x16x3xf32>
    %18 = tpu.concatenate %9, %10, %11, %12, %13, %14, %15, %16, %17 in 2 : vector<8x16x3xf32>, vector<8x16x3xf32>, vector<8x16x3xf32>, vector<8x16x3xf32>, vector<8x16x3xf32>, vector<8x16x3xf32>, vector<8x16x3xf32>, vector<8x16x3xf32>, vector<8x16x3xf32> -> vector<8x16x27xf32>
    %19 = vector.shape_cast %18 : vector<8x16x27xf32> to vector<128x27xf32>
    %c0_11 = arith.constant 0 : index
    %c0_12 = arith.constant 0 : index
    %20 = vector.load %arg5[%c0_11, %c0_12] : memref<27x8xf32, #tpu.memory_space<vmem>>, vector<27x8xf32>
    %cst = arith.constant dense<0.000000e+00> : vector<128x8xf32>
    %21 = tpu.matmul %19, %20, %cst {dimension_numbers = #tpu.dot_dimension_numbers<[1], [0], [0], [1], [0, 0, 1, 1], [], []>} : vector<128x27xf32>, vector<27x8xf32>, vector<128x8xf32> -> vector<128x8xf32>
    %c0_13 = arith.constant 0 : index
    %c0_14 = arith.constant 0 : index
    %22 = vector.load %arg6[%c0_13, %c0_14] : memref<1x8xf32, #tpu.memory_space<vmem>>, vector<1x8xf32>
    %23 = vector.broadcast %22 : vector<1x8xf32> to vector<128x8xf32>
    %24 = arith.addf %21, %23 : vector<128x8xf32>
    %c0_15 = arith.constant 0 : index
    %25 = memref.load %arg7[%c0_15] : memref<1xf32, #tpu.memory_space<smem>>
    %cst_16 = arith.constant 0.000000e+00 : f32
    %26 = vector.broadcast %cst_16 : f32 to vector<128x8xf32>
    %27 = arith.cmpf oge, %24, %26 : vector<128x8xf32>
    %28 = vector.broadcast %25 : f32 to vector<128x8xf32>
    %29 = arith.mulf %28, %24 : vector<128x8xf32>
    %30 = arith.select %27, %24, %29 : vector<128x8xi1>, vector<128x8xf32>
    %c0_17 = arith.constant 0 : index
    %c0_18 = arith.constant 0 : index
    %c0_19 = arith.constant 0 : index
    %31 = vector.load %arg8[%c0_17, %c0_18, %c0_19] : memref<1x128x8xf32, #tpu.memory_space<vmem>>, vector<1x128x8xf32>
    %32 = vector.shape_cast %31 : vector<1x128x8xf32> to vector<128x8xf32>
    %33 = vector.shape_cast %30 : vector<128x8xf32> to vector<1x128x8xf32>
    tpu.vector_store %arg8[%c0_17, %c0_18, %c0_19], %33 {strides = array<i32>} : memref<1x128x8xf32, #tpu.memory_space<vmem>>, vector<1x128x8xf32>,
    return
  }
  func.func @transform_0(%arg0: i32, %arg1: i32) -> (i32, i32, i32, i32) {
    %c0_i32 = arith.constant 0 : i32
    %c0_i32_0 = arith.constant 0 : i32
    %c0_i32_1 = arith.constant 0 : i32
    return %arg0, %arg1, %c0_i32, %c0_i32_0 : i32, i32, i32, i32
  }
  func.func @transform_1(%arg0: i32, %arg1: i32) -> (i32, i32, i32, i32) {
    %c8_i32 = arith.constant 8 : i32
    %0 = arith.muli %arg1, %c8_i32 : i32
    %c8_i32_0 = arith.constant 8 : i32
    %1 = arith.addi %0, %c8_i32_0 : i32
    %c0_i32 = arith.constant 0 : i32
    %c0_i32_1 = arith.constant 0 : i32
    %c0_i32_2 = arith.constant 0 : i32
    return %arg0, %1, %c0_i32, %c0_i32_1 : i32, i32, i32, i32
  }
  func.func @transform_2(%arg0: i32, %arg1: i32) -> (i32, i32, i32, i32) {
    %c8_i32 = arith.constant 8 : i32
    %0 = arith.muli %arg1, %c8_i32 : i32
    %c8_i32_0 = arith.constant 8 : i32
    %1 = arith.addi %0, %c8_i32_0 : i32
    %c1_i32 = arith.constant 1 : i32
    %2 = arith.addi %1, %c1_i32 : i32
    %c0_i32 = arith.constant 0 : i32
    %c0_i32_1 = arith.constant 0 : i32
    %c0_i32_2 = arith.constant 0 : i32
    return %arg0, %2, %c0_i32, %c0_i32_1 : i32, i32, i32, i32
  }
  func.func @transform_3(%arg0: i32, %arg1: i32) -> (i32, i32) {
    %c0_i32 = arith.constant 0 : i32
    %c0_i32_0 = arith.constant 0 : i32
    %c0_i32_1 = arith.constant 0 : i32
    return %c0_i32, %c0_i32_0 : i32, i32
  }
  func.func @transform_4(%arg0: i32, %arg1: i32) -> (i32, i32) {
    %c0_i32 = arith.constant 0 : i32
    %c0_i32_0 = arith.constant 0 : i32
    %c0_i32_1 = arith.constant 0 : i32
    return %c0_i32, %c0_i32_0 : i32, i32
  }
  func.func @transform_5(%arg0: i32, %arg1: i32) -> i32 {
    %c0_i32 = arith.constant 0 : i32
    %c0_i32_0 = arith.constant 0 : i32
    return %c0_i32 : i32
  }
  func.func @transform_6(%arg0: i32, %arg1: i32) -> (i32, i32, i32) {
    %c0_i32 = arith.constant 0 : i32
    %c0_i32_0 = arith.constant 0 : i32
    return %arg0, %arg1, %c0_i32 : i32, i32, i32
  }
}

</mosaic_0001>

<bundles_post_ra>
// kernel: tpu_custom_call.1
= control target key start
LH: loop header
LB: loop body
LE: loop exit
PB: predicated region body
PF: predicated region fallthrough
CT: control target
= control target key end

     0   :  { %s1745_s23 = smov 0   ;;  %s1747_s24 = smov 0   ;;  %s2555_s0 = inlined_call_operand.vmem [shape: f32[2,18,18,3], index: 0, kind: input, shape index: {}]   ;;  %s2556_s1 = inlined_call_operand.vmem [shape: f32[2,18,18,3], index: 1, kind: input, shape index: {}]   ;;  %s2557_s2 = inlined_call_operand.vmem [shape: f32[2,18,18,3], index: 2, kind: input, shape index: {}]   ;;  %s2558_s3 = inlined_call_operand.vmem [shape: f32[27,8], index: 3, kind: input, shape index: {}]   ;;  %s2559_s4 = inlined_call_operand.vmem [shape: f32[1,8], index: 4, kind: input, shape index: {}]   ;;  %s2560_s5 = inlined_call_operand.<no memory space> [shape: f32[1], index: 5, kind: input, shape index: {}]   ;;  %s2561_s6 = inlined_call_operand.vmem [shape: f32[2,256,8], index: 6, kind: output, shape index: {}]  }
   0x1   :  { %11 = sst [smem:[#allocation2]] %s2560_s5  ;;  %s1749_s25 = smov 0  }
   0x2   :  { %s1751_s26 = smov 0   ;;  %s1753_s27 = smov 0  }
   0x3 LB: > { %s26_s5 = sadd.s32 1, %s1689_s25  ;;  %s29_s28 = sadd.s32 1, %s1693_s26  ;;  %s1697_s27 = sphi %s1753_s27, %s17_s27   ;;  %s1693_s26 = sphi %s1751_s26, %s2593_s26   ;;  %s1689_s25 = sphi %s1749_s25, %s2592_s25   ;;  %s1685_s24 = sphi %s1747_s24, %s2591_s24   ;;  %s1681_s23 = sphi %s1745_s23, %s2590_s23  }
   0x4   : > { %p27_p0 = scmp.ge.s32.totalorder %s26_s5, 2  ;;  %p1517_p1 = scmp.ge.s32.totalorder %s1697_s27, 1 }
   0x5   : > { %p293_p2 = scmp.lt.s32.totalorder %s1697_s27, 5 }
   0x6   : > { %s2595_s5 = smov (%p27_p0, %s26_s5), 0  ;;  %s2597_s28 = smov (!%p27_p0, %s29_s28), %s1693_s26 }
   0x7   : > { %p294_p3 = pnand %p1517_p1, %p293_p2  ;;  %p31_p4 = scmp.ge.s32.totalorder %s2597_s28, 2 }
   0x9   : > { %s2599_s28 = smov (%p31_p4, %s2597_s28), 0  ;;  %297 = sbr.rel (%p294_p3) target bundleno = 598 (0x256), region = 44 }
   0xe   : > { %s1778_s29 = sshll.u32 %s1681_s23, 3  ;;  %p365_p5 = scmp.lt.s32.totalorder %s1685_s24, 1  ;;  %vm470_vm0 = vcmask 1046528   ;;  %vm559_vm1 = vcmask 1045504   ;;  %vm1158_vm2 = vcmask 1042432   ;;  %vm962_vm3 = vcmask 23552  }
   0xf   : > { %p367_p6 = scmp.lt.s32.totalorder %s1778_s29, 17  ;;  %s1699_s14 = smov 3   ;;  %vm979_vm4 = vcmask 48128   ;;  %vm996_vm5 = vcmask 72704   ;;  %vm1013_vm6 = vcmask 97280   ;;  %vm1030_vm7 = vcmask 121856  }
  0x10   : > { %s2601_s24 = smov (!%p365_p5, %s1685_s24), 1  ;;  %s1700_s15 = smov 6   ;;  %vm1047_vm8 = vcmask 146432   ;;  %vm1064_vm9 = vcmask 171008   ;;  %vm1081_vm10 = vcmask 195584   ;;  %vm1109_vm11 = vcmask 220160  }
  0x11   : > { %s368_s30 = scalar_select %p367_p6, %s1778_s29, 17  ;;  %vm1357_vm12 = vcmask 64512  }
  0x12   : > { %s1785_s7 = smul.u32 54, %s2601_s24  ;;  %s1701_s16 = smov 9  }
  0x13   : > { %s1607_s8 = smul.u32 3, %s368_s30  ;;  %s1702_s17 = smov 12  }
  0x14   : > { %s1703_s18 = smov 15   ;;  %s1704_s19 = smov 18  }
  0x15   : > { %s371_s9 = sadd.s32 %s1785_s7, %s1607_s8  ;;  %s1705_s20 = smov 21  }
  0x16   : > { %s1519_s10 = sshll.u32 %s371_s9, 3  ;;  %s1706_s11 = smov 24  }
  0x17   : > { %s1791_s13 = scalar_lea.vmem %s2555_s0, %s1519_s10 }
  0x18   : > { %v1794_v0 = vld [vmem:[%s1791_s13 + $0x8] sm:$0xff]  ;;  %v418_v1 = vld [vmem:[%s1791_s13 + $0x10] sm:$0x3]  ;;  %v1798_v2 = vld [vmem:[%s1791_s13] sm:$0xff] }
  0x19   : > { %v472_v3 = vrot.slane %v1794_v0, 1  ;;  %v474_v4 = vrot.slane %v418_v1, 1  ;;  %v471_v5 = vrot.slane %v1798_v2, 1  ;;  %v1803_v6 = vld [vmem:[%s1791_s13 + $0x68] sm:$0xff]  ;;  %v430_v7 = vld [vmem:[%s1791_s13 + $0x70] sm:$0x3] }
  0x1a   : > { %v492_v8 = vrot.slane %v1803_v6, 1  ;;  %v494_v9 = vrot.slane %v430_v7, 1  ;;  %v1808_v10 = vld [vmem:[%s1791_s13 + $0x60] sm:$0xff]  ;;  %v581_v14 = vrot.slane %v1803_v6, 2  ;;  %v560_v15 = vrot.slane %v1798_v2, 2  ;;  %v1844_v26 = vld [vmem:[%s1791_s13 + $0x78] sm:$0xff] }
  0x1b   : > { %v475_v11 = vsel %vm470_vm0, %v472_v3, %v474_v4  ;;  %v473_v12 = vsel %vm470_vm0, %v471_v5, %v472_v3  ;;  %v491_v13 = vrot.slane %v1808_v10, 1  ;;  %v580_v18 = vrot.slane %v1808_v10, 2  ;;  %v1847_v27 = vld [vmem:[%s1791_s13 + $0x18] sm:$0xff]  ;;  %v1850_v28 = vld [vmem:[%s1791_s13 + $0x80] sm:$0xff]  ;;  %v433_v36 = vld [vmem:[%s1791_s13 + $0x88] sm:$0x3] }
  0x1c   : > { %513 = vrot.lane.b32.xlu1 %v475_v11, %s1699_s14  ;;  %511 = vrot.lane.b32.xlu0 %v473_v12, %s1699_s14  ;;  %v1818_v16 = vsel %vm470_vm0, %v492_v8, %v494_v9  ;;  %v561_v19 = vrot.slane %v1794_v0, 2  ;;  %v583_v22 = vrot.slane %v430_v7, 2  ;;  %v563_v23 = vrot.slane %v418_v1, 2  ;;  %v1853_v29 = vld [vmem:[%s1791_s13 + $0x20] sm:$0xff]  ;;  %v421_v37 = vld [vmem:[%s1791_s13 + $0x28] sm:$0x3] }
  0x1d   : > { %v1821_v17 = vsel %vm470_vm0, %v491_v13, %v492_v8  ;;  %v1830_v20 = vsel %vm559_vm1, %v580_v18, %v581_v14  ;;  %v496_v30 = vrot.slane %v1844_v26, 1  ;;  %v497_v31 = vrot.slane %v1850_v28, 1  ;;  %v1911_v52 = vld [vmem:[%s1791_s13 + $0x90] sm:$0xff]  ;;  %v1924_v54 = vld [vmem:[%s1791_s13 + $0x98] sm:$0xff]  ;;  %v436_v62 = vld [vmem:[%s1791_s13 + $0xa0] sm:$0x3] }
  0x1e   : > { %v562_v21 = vsel %vm559_vm1, %v560_v15, %v561_v19  ;;  %v1837_v24 = vsel %vm559_vm1, %v581_v14, %v583_v22  ;;  %v564_v25 = vsel %vm559_vm1, %v561_v19, %v563_v23  ;;  %v476_v32 = vrot.slane %v1847_v27, 1  ;;  %v1914_v53 = vld [vmem:[%s1791_s13 + $0x30] sm:$0xff]  ;;  %v1927_v55 = vld [vmem:[%s1791_s13 + $0x38] sm:$0xff]  ;;  %v424_v63 = vld [vmem:[%s1791_s13 + $0x40] sm:$0x3] }
  0x1f   : > { %v477_v33 = vrot.slane %v1853_v29, 1  ;;  %v1868_v34 = vsel %vm470_vm0, %v496_v30, %v497_v31  ;;  %v499_v38 = vrot.slane %v433_v36, 1  ;;  %v479_v39 = vrot.slane %v421_v37, 1  ;;  %2575 = vst [vmem:[#allocation7_spill] sm:$0xff] %v1927_v55  ;;  %v1101_v12 = vld [vmem:[%s2558_s3 + $0x18] sm:$0x7] }
  0x20   : > { %529 = vrot.lane.b32.xlu1 %v1818_v16, %s1699_s14  ;;  %527 = vrot.lane.b32.xlu0 %v1821_v17, %s1699_s14  ;;  %2571 = vst [vmem:[#allocation3_spill] sm:$0xff] %v1868_v34  ;;  %v585_v40 = vrot.slane %v1844_v26, 2  ;;  %v586_v41 = vrot.slane %v1850_v28, 2  ;;  %v565_v44 = vrot.slane %v1847_v27, 2  ;;  %v566_v45 = vrot.slane %v1853_v29, 2  ;;  %v1100_v15 = vld [vmem:[%s2558_s3 + $0x10] sm:$0xff] }
  0x21   : > { %v478_v35 = vsel %vm470_vm0, %v476_v32, %v477_v33  ;;  %v1882_v42 = vsel %vm470_vm0, %v497_v31, %v499_v38  ;;  %v480_v43 = vsel %vm470_vm0, %v477_v33, %v479_v39  ;;  %v588_v48 = vrot.slane %v433_v36, 2  ;;  %1567 = vmatprep.subr.msk.mxu0 %vm1158_vm2, %v1101_v12  ;;  %1599 = vmatprep.subr.msk.mxu1 %vm1158_vm2, %v1101_v12  ;;  %v1099_v18 = vld [vmem:[%s2558_s3 + $0x8] sm:$0xff]  ;;  %v1098_v19 = vld [vmem:[%s2558_s3] sm:$0xff]  ;;  %v2018_v39 = vld [vmem:[%s1791_s13 + $0xb0] sm:$0xff] }
  0x22   : > { %2572 = vst [vmem:[#allocation4_spill] sm:$0xff] %v1882_v42  ;;  %v1891_v46 = vsel %vm559_vm1, %v585_v40, %v586_v41  ;;  %v567_v47 = vsel %vm559_vm1, %v565_v44, %v566_v45  ;;  %v568_v49 = vrot.slane %v421_v37, 2  ;;  %v501_v56 = vrot.slane %v1911_v52, 1  ;;  %1568 = vmatpush3.msk.msra.mxu0 %vm1158_vm2, %v1101_v12  ;;  %1603 = vmatpush3.msk.msra.mxu1 %vm1158_vm2, %v1101_v12  ;;  %v1994_v30 = vld [vmem:[%s1791_s13 + $0xa8] sm:$0xff]  ;;  %v2021_v40 = vld [vmem:[%s1791_s13 + $0x50] sm:$0xff] }
  0x23   : > { %2573 = vst [vmem:[#allocation5_spill] sm:$0xff] %v1891_v46  ;;  %v1904_v50 = vsel %vm559_vm1, %v586_v41, %v588_v48  ;;  %v502_v57 = vrot.slane %v1924_v54, 1  ;;  %v481_v58 = vrot.slane %v1914_v53, 1  ;;  %v482_v59 = vrot.slane %v1927_v55, 1  ;;  %1569 = vmatprep.subr.mxu0 %v1100_v15  ;;  %1600 = vmatprep.subr.mxu1 %v1100_v15  ;;  %2576 = vst [vmem:[#allocation8_spill] sm:$0xff] %v1994_v30  ;;  %v1997_v31 = vld [vmem:[%s1791_s13 + $0x48] sm:$0xff] }
  0x24   : > { %616 = vrot.lane.b32.xlu1 %v1830_v20, %s1700_s15  ;;  %600 = vrot.lane.b32.xlu0 %v562_v21, %s1700_s15  ;;  %2574 = vst [vmem:[#allocation6_spill] sm:$0xff] %v1904_v50  ;;  %v569_v51 = vsel %vm559_vm1, %v566_v45, %v568_v49  ;;  %v504_v1 = vrot.slane %v436_v62, 1  ;;  %v484_v3 = vrot.slane %v424_v63, 1  ;;  %v590_v4 = vrot.slane %v1911_v52, 2  ;;  %2577 = vst [vmem:[#allocation9_spill] sm:$0xff] %v1997_v31 }
  0x25   : > { %v503_v60 = vsel %vm470_vm0, %v501_v56, %v502_v57  ;;  %v483_v61 = vsel %vm470_vm0, %v481_v58, %v482_v59  ;;  %v591_v5 = vrot.slane %v1924_v54, 2  ;;  %v570_v9 = vrot.slane %v1914_v53, 2  ;;  %1570 = vmatpush3.msra.mxu0 %v1100_v15  ;;  %1604 = vmatpush3.msra.mxu1 %v1100_v15  ;;  %2578 = vst [vmem:[#allocation10_spill] sm:$0xff] %v2018_v39  ;;  %v439_v58 = vld [vmem:[%s1791_s13 + $0xb8] sm:$0x3] }
  0x26   : > { %v505_v7 = vsel %vm470_vm0, %v502_v57, %v504_v1  ;;  %v485_v8 = vsel %vm470_vm0, %v482_v59, %v484_v3  ;;  %v571_v11 = vrot.slane %v1927_v55, 2  ;;  %1571 = vmatprep.subr.mxu0 %v1099_v18  ;;  %1601 = vmatprep.subr.mxu1 %v1099_v18  ;;  %v593_v21 = vrot.slane %v436_v62, 2  ;;  %2579 = vst [vmem:[#allocation11_spill] sm:$0xff] %v2021_v40  ;;  %v427_v59 = vld [vmem:[%s1791_s13 + $0x58] sm:$0x3]  ;;  %s381_s13 = sadd.s32 8, %s1778_s29 }
  0x27   : > { %v592_v13 = vsel %vm559_vm1, %v590_v4, %v591_v5  ;;  %1572 = vmatpush3.msra.mxu0 %v1099_v18  ;;  %1605 = vmatpush3.msra.mxu1 %v1099_v18  ;;  %v573_v22 = vrot.slane %v424_v63, 2  ;;  %v506_v41 = vrot.slane %v1994_v30, 1  ;;  %v486_v44 = vrot.slane %v1997_v31, 1  ;;  %p384_p7 = scmp.lt.s32.totalorder %s381_s13, 17 }
  0x28   : > { %618 = vrot.lane.b32.xlu1 %v1837_v24, %s1700_s15  ;;  %602 = vrot.lane.b32.xlu0 %v564_v25, %s1700_s15  ;;  %v572_v14 = vsel %vm559_vm1, %v570_v9, %v571_v11  ;;  %v594_v23 = vsel %vm559_vm1, %v591_v5, %v593_v21  ;;  %v487_v45 = vrot.slane %v2021_v40, 1  ;;  %v509_v62 = vrot.slane %v439_v58, 1 }
  0x29   : > { %1573 = vmatprep.subr.mxu0 %v1098_v19  ;;  %1602 = vmatprep.subr.mxu1 %v1098_v19  ;;  %v574_v25 = vsel %vm559_vm1, %v571_v11, %v573_v22  ;;  %v489_v63 = vrot.slane %v427_v59, 1  ;;  %v575_v9 = vrot.slane %v1997_v31, 2  ;;  %v576_v11 = vrot.slane %v2021_v40, 2  ;;  %s2603_s13 = smov (!%p384_p7, %s381_s13), 17 }
  0x2a   : > { %1574 = vmatpush3.msra.mxu0 %v1098_v19  ;;  %1606 = vmatpush3.msra.mxu1 %v1098_v19  ;;  %s1609_s22 = smul.u32 3, %s2603_s13 }
  0x2b   : > { %v490_v5 = vsel %vm470_vm0, %v487_v45, %v489_v63  ;;  %v577_v15 = vsel %vm559_vm1, %v575_v9, %v576_v11 }
  0x2c   : > { %666 = vrot.lane.b32.xlu1 %v1844_v26, %s1701_s16  ;;  %650 = vrot.lane.b32.xlu0 %v1847_v27, %s1701_s16  ;;  %s388_s30 = sadd.s32 %s1609_s22, %s1785_s7 }
  0x2d   : > { %s1521_s8 = sshll.u32 %s388_s30, 3 }
  0x2e   : > { %s2122_s12 = scalar_lea.vmem %s2556_s1, %s1521_s8 }
  0x30   : > { %668 = vrot.lane.b32.xlu1 %v1850_v28, %s1701_s16  ;;  %652 = vrot.lane.b32.xlu0 %v1853_v29, %s1701_s16 }
  0x34   : > { %720 = vrot.lane.b32.xlu1 %v1868_v34, %s1702_s17  ;;  %704 = vrot.lane.b32.xlu0 %v478_v35, %s1702_s17 }
  0x38   : > { %531 = vrot.lane.b32.xlu1 %v1868_v34, %s1699_s14  ;;  %515 = vrot.lane.b32.xlu0 %v478_v35, %s1699_s14 }
  0x3c   : > { %722 = vrot.lane.b32.xlu1 %v1882_v42, %s1702_s17  ;;  %706 = vrot.lane.b32.xlu0 %v480_v43, %s1702_s17 }
  0x40   : > { %773 = vrot.lane.b32.xlu1 %v1891_v46, %s1703_s18  ;;  %757 = vrot.lane.b32.xlu0 %v567_v47, %s1703_s18 }
  0x44   : > { %533 = vrot.lane.b32.xlu1 %v1882_v42, %s1699_s14  ;;  %517 = vrot.lane.b32.xlu0 %v480_v43, %s1699_s14  ;;  %v507_v43 = vrot.slane %v2018_v39, 1 }
  0x46   : > { %v508_v49 = vsel %vm470_vm0, %v506_v41, %v507_v43  ;;  %v510_v4 = vsel %vm470_vm0, %v507_v43, %v509_v62  ;;  %v598_v41 = vrot.slane %v439_v58, 2  ;;  %v578_v43 = vrot.slane %v427_v59, 2 }
  0x48   : > { %620 = vrot.lane.b32.xlu1 %v1891_v46, %s1700_s15  ;;  %604 = vrot.lane.b32.xlu0 %v567_v47, %s1700_s15 }
  0x4c   : > { %775 = vrot.lane.b32.xlu1 %v1904_v50, %s1703_s18  ;;  %759 = vrot.lane.b32.xlu0 %v569_v51, %s1703_s18 }
  0x50   : > { %823 = vrot.lane.b32.xlu1 %v1911_v52, %s1704_s19  ;;  %807 = vrot.lane.b32.xlu0 %v1914_v53, %s1704_s19 }
  0x54   : > { %622 = vrot.lane.b32.xlu1 %v1904_v50, %s1700_s15  ;;  %606 = vrot.lane.b32.xlu0 %v569_v51, %s1700_s15  ;;  %v488_v51 = vsel %vm470_vm0, %v486_v44, %v487_v45 }
  0x58   : > { %670 = vrot.lane.b32.xlu1 %v1911_v52, %s1701_s16  ;;  %654 = vrot.lane.b32.xlu0 %v1914_v53, %s1701_s16 }
  0x5c   : > { %825 = vrot.lane.b32.xlu1 %v1924_v54, %s1704_s19  ;;  %809 = vrot.lane.b32.xlu0 %v1927_v55, %s1704_s19 }
  0x60   : > { %877 = vrot.lane.b32.xlu1 %v503_v60, %s1705_s20  ;;  %861 = vrot.lane.b32.xlu0 %v483_v61, %s1705_s20 }
  0x64   : > { %672 = vrot.lane.b32.xlu1 %v1924_v54, %s1701_s16  ;;  %656 = vrot.lane.b32.xlu0 %v1927_v55, %s1701_s16 }
  0x68   : > { %724 = vrot.lane.b32.xlu1 %v503_v60, %s1702_s17  ;;  %708 = vrot.lane.b32.xlu0 %v483_v61, %s1702_s17 }
  0x6c   : > { %879 = vrot.lane.b32.xlu1 %v505_v7, %s1705_s20  ;;  %863 = vrot.lane.b32.xlu0 %v485_v8, %s1705_s20 }
  0x70   : > { %930 = vrot.lane.b32.xlu1 %v592_v13, %s1706_s11  ;;  %914 = vrot.lane.b32.xlu0 %v572_v14, %s1706_s11 }
  0x74   : > { %535 = vrot.lane.b32.xlu1 %v503_v60, %s1699_s14  ;;  %519 = vrot.lane.b32.xlu0 %v483_v61, %s1699_s14 }
  0x78   : > { %726 = vrot.lane.b32.xlu1 %v505_v7, %s1702_s17  ;;  %710 = vrot.lane.b32.xlu0 %v485_v8, %s1702_s17 }
  0x7c   : > { %777 = vrot.lane.b32.xlu1 %v592_v13, %s1703_s18  ;;  %761 = vrot.lane.b32.xlu0 %v572_v14, %s1703_s18 }
  0x80   : > { %932 = vrot.lane.b32.xlu1 %v594_v23, %s1706_s11  ;;  %916 = vrot.lane.b32.xlu0 %v574_v25, %s1706_s11 }
  0x84   : > { %537 = vrot.lane.b32.xlu1 %v505_v7, %s1699_s14  ;;  %521 = vrot.lane.b32.xlu0 %v485_v8, %s1699_s14  ;;  %v595_v7 = vrot.slane %v1994_v30, 2  ;;  %v596_v8 = vrot.slane %v2018_v39, 2 }
  0x88   : > { %624 = vrot.lane.b32.xlu1 %v592_v13, %s1700_s15  ;;  %608 = vrot.lane.b32.xlu0 %v572_v14, %s1700_s15  ;;  %v597_v14 = vsel %vm559_vm1, %v595_v7, %v596_v8 }
  0x8c   : > { %779 = vrot.lane.b32.xlu1 %v594_v23, %s1703_s18  ;;  %763 = vrot.lane.b32.xlu0 %v574_v25, %s1703_s18 }
  0x8e   : > { %v1999_v32 = vpop.permute.xlu1 %513  ;;  %v2001_v33 = vpop.permute.xlu0 %511 }
  0x90   : > { %827 = vrot.lane.b32.xlu1 %v1994_v30, %s1704_s19  ;;  %811 = vrot.lane.b32.xlu0 %v1997_v31, %s1704_s19 }
  0x92   : > { %v2007_v35 = vpop.permute.xlu1 %529  ;;  %v2009_v36 = vpop.permute.xlu0 %527 }
  0x94   : > { %626 = vrot.lane.b32.xlu1 %v594_v23, %s1700_s15  ;;  %610 = vrot.lane.b32.xlu0 %v574_v25, %s1700_s15 }
  0x96   : > { %v2013_v37 = vpop.permute.xlu1 %616  ;;  %v2015_v38 = vpop.permute.xlu0 %600 }
  0x98   : > { %674 = vrot.lane.b32.xlu1 %v1994_v30, %s1701_s16  ;;  %658 = vrot.lane.b32.xlu0 %v1997_v31, %s1701_s16 }
  0x9a   : > { %v2031_v47 = vpop.permute.xlu1 %618  ;;  %v2033_v48 = vpop.permute.xlu0 %602 }
  0x9c   : > { %829 = vrot.lane.b32.xlu1 %v2018_v39, %s1704_s19  ;;  %813 = vrot.lane.b32.xlu0 %v2021_v40, %s1704_s19 }
  0x9e   : > { %v2041_v56 = vpop.permute.xlu1 %666  ;;  %v2043_v57 = vpop.permute.xlu0 %650 }
  0xa0   : > { %881 = vrot.lane.b32.xlu1 %v508_v49, %s1705_s20  ;;  %865 = vrot.lane.b32.xlu0 %v488_v51, %s1705_s20 }
  0xa2   : > { %v2049_v60 = vpop.permute.xlu1 %668  ;;  %v2051_v61 = vpop.permute.xlu0 %652 }
  0xa4   : > { %676 = vrot.lane.b32.xlu1 %v2018_v39, %s1701_s16  ;;  %660 = vrot.lane.b32.xlu0 %v2021_v40, %s1701_s16  ;;  %v2144_v39 = vld [vmem:[%s2122_s12 + $0x8] sm:$0xff] }
  0xa5   : > { %v700_v46 = vrot.slane %v2144_v39, 1 }
  0xa6   : > { %v2057_v1 = vpop.permute.xlu1 %720  ;;  %v2059_v3 = vpop.permute.xlu0 %704 }
  0xa8   : > { %728 = vrot.lane.b32.xlu1 %v508_v49, %s1702_s17  ;;  %712 = vrot.lane.b32.xlu0 %v488_v51, %s1702_s17 }
  0xaa   : > { %v2069_v12 = vpop.permute.xlu1 %531  ;;  %v2071_v13 = vpop.permute.xlu0 %515 }
  0xab   : > { %v973_v31 = vsel %vm962_vm3, %v1844_v26, %v2069_v12  ;;  %v965_v30 = vsel %vm962_vm3, %v1847_v27, %v2071_v13 }
  0xac   : > { %883 = vrot.lane.b32.xlu1 %v510_v4, %s1705_s20  ;;  %867 = vrot.lane.b32.xlu0 %v490_v5, %s1705_s20 }
  0xae   : > { %v2077_v18 = vpop.permute.xlu1 %722  ;;  %v2079_v19 = vpop.permute.xlu0 %706 }
  0xb0   : > { %934 = vrot.lane.b32.xlu1 %v597_v14, %s1706_s11  ;;  %918 = vrot.lane.b32.xlu0 %v577_v15, %s1706_s11 }
  0xb2   : > { %v2083_v21 = vpop.permute.xlu1 %773  ;;  %v2085_v22 = vpop.permute.xlu0 %757 }
  0xb4   : > { %539 = vrot.lane.b32.xlu1 %v508_v49, %s1699_s14  ;;  %523 = vrot.lane.b32.xlu0 %v488_v51, %s1699_s14  ;;  %v599_v49 = vsel %vm559_vm1, %v596_v8, %v598_v41  ;;  %v579_v51 = vsel %vm559_vm1, %v576_v11, %v578_v43 }
  0xb6   : > { %v2090_v23 = vpop.permute.xlu1 %533  ;;  %v2092_v25 = vpop.permute.xlu0 %517 }
  0xb8   : > { %730 = vrot.lane.b32.xlu1 %v510_v4, %s1702_s17  ;;  %714 = vrot.lane.b32.xlu0 %v490_v5, %s1702_s17 }
  0xba   : > { %v621_v44 = vpop.permute.xlu1 %620  ;;  %v605_v45 = vpop.permute.xlu0 %604 }
  0xbc   : > { %781 = vrot.lane.b32.xlu1 %v597_v14, %s1703_s18  ;;  %765 = vrot.lane.b32.xlu0 %v577_v15, %s1703_s18 }
  0xbe   : > { %v2100_v62 = vpop.permute.xlu1 %775  ;;  %v2102_v63 = vpop.permute.xlu0 %759 }
  0xc0   : > { %936 = vrot.lane.b32.xlu1 %v599_v49, %s1706_s11  ;;  %920 = vrot.lane.b32.xlu0 %v579_v51, %s1706_s11 }
  0xc2   : > { %v2106_v58 = vpop.permute.xlu1 %823  ;;  %v2108_v59 = vpop.permute.xlu0 %807 }
  0xc4   : > { %541 = vrot.lane.b32.xlu1 %v510_v4, %s1699_s14  ;;  %525 = vrot.lane.b32.xlu0 %v490_v5, %s1699_s14  ;;  %v2127_v4 = vld [vmem:[%s2122_s12] sm:$0xff]  ;;  %s394_s14 = sadd.s32 9, %s1778_s29 }
  0xc5   : > { %v699_v50 = vrot.slane %v2127_v4, 1  ;;  %p2254_p8 = scmp.lt.s32.totalorder %s394_s14, 17 }
  0xc6   : > { %v2113_v7 = vpop.permute.xlu1 %622  ;;  %v2115_v8 = vpop.permute.xlu0 %606 }
  0xc7   : > { %s2605_s14 = smov (!%p2254_p8, %s394_s14), 17 }
  0xc8   : > { %628 = vrot.lane.b32.xlu1 %v597_v14, %s1700_s15  ;;  %612 = vrot.lane.b32.xlu0 %v577_v15, %s1700_s15 }
  0xca   : > { %v671_v9 = vpop.permute.xlu1 %670  ;;  %v655_v11 = vpop.permute.xlu0 %654 }
  0xcc   : > { %783 = vrot.lane.b32.xlu1 %v599_v49, %s1703_s18  ;;  %767 = vrot.lane.b32.xlu0 %v579_v51, %s1703_s18 }
  0xce   : > { %v2129_v5 = vpop.permute.xlu1 %825  ;;  %v2131_v14 = vpop.permute.xlu0 %809 }
  0xd0   : > { %831 = vrot.lane.b32.xlu1 %v2127_v4, %s1704_s19  ;;  %815 = vrot.lane.b32.xlu0 %v1808_v10, %s1704_s19 }
  0xd2   : > { %v878_v15 = vpop.permute.xlu1 %877  ;;  %v862_v41 = vpop.permute.xlu0 %861 }
  0xd4   : > { %630 = vrot.lane.b32.xlu1 %v599_v49, %s1700_s15  ;;  %614 = vrot.lane.b32.xlu0 %v579_v51, %s1700_s15  ;;  %v990_v49 = vsel %vm979_vm4, %v973_v31, %v621_v44  ;;  %v982_v51 = vsel %vm979_vm4, %v965_v30, %v605_v45  ;;  %v963_v30 = vsel %vm962_vm3, %v1798_v2, %v2001_v33  ;;  %s1610_s15 = smul.u32 3, %s2605_s14 }
  0xd5   : > { %v1007_v12 = vsel %vm996_vm5, %v990_v49, %v671_v9  ;;  %v999_v42 = vsel %vm996_vm5, %v982_v51, %v655_v11  ;;  %v971_v31 = vsel %vm962_vm3, %v1808_v10, %v2009_v36  ;;  %v701_v45 = vsel %vm470_vm0, %v699_v50, %v700_v46 }
  0xd6   : > { %v2139_v43 = vpop.permute.xlu1 %672  ;;  %v2141_v40 = vpop.permute.xlu0 %656  ;;  %v988_v44 = vsel %vm979_vm4, %v971_v31, %v2013_v37  ;;  %v753_v31 = vrot.slane %v2144_v39, 2 }
  0xd7   : > { %v1005_v2 = vsel %vm996_vm5, %v988_v44, %v2041_v56 }
  0xd8   : > { %678 = vrot.lane.b32.xlu1 %v2127_v4, %s1701_s16  ;;  %662 = vrot.lane.b32.xlu0 %v1808_v10, %s1701_s16  ;;  %v1022_v37 = vsel %vm1013_vm6, %v1005_v2, %v2057_v1 }
  0xd9   : > { %v1039_v50 = vsel %vm1030_vm7, %v1022_v37, %v2083_v21 }
  0xda   : > { %v725_v27 = vpop.permute.xlu1 %724  ;;  %v709_v13 = vpop.permute.xlu0 %708 }
  0xdb   : > { %v2163_v34 = vsel %vm1013_vm6, %v1007_v12, %v725_v27  ;;  %v2166_v55 = vsel %vm1013_vm6, %v999_v42, %v709_v13  ;;  %v980_v42 = vsel %vm979_vm4, %v963_v30, %v2015_v38  ;;  %v966_v12 = vsel %vm962_vm3, %v1853_v29, %v2092_v25 }
  0xdc   : > { %833 = vrot.lane.b32.xlu1 %v2144_v39, %s1704_s19  ;;  %817 = vrot.lane.b32.xlu0 %v1803_v6, %s1704_s19  ;;  %v997_v10 = vsel %vm996_vm5, %v980_v42, %v2043_v57  ;;  %v1056_v57 = vsel %vm1047_vm8, %v1039_v50, %v2106_v58  ;;  %v752_v27 = vrot.slane %v2127_v4, 2  ;;  %v983_v30 = vsel %vm979_vm4, %v966_v12, %v2115_v8 }
  0xdd   : > { %v1014_v38 = vsel %vm1013_vm6, %v997_v10, %v2059_v3  ;;  %v2207_v3 = vld [vmem:[%s2122_s12 + $0x10] sm:$0x3]  ;;  %v1073_v21 = vsel %vm1064_vm9, %v1056_v57, %v878_v15  ;;  %v1000_v25 = vsel %vm996_vm5, %v983_v30, %v2141_v40 }
  0xde   : > { %v2187_v33 = vpop.permute.xlu1 %879  ;;  %v2189_v36 = vpop.permute.xlu0 %863  ;;  %v1031_v56 = vsel %vm1030_vm7, %v1014_v38, %v2085_v22  ;;  %v702_v58 = vrot.slane %v2207_v3, 1 }
  0xdf   : > { %v1048_v1 = vsel %vm1047_vm8, %v1031_v56, %v2108_v59 }
  0xe0   : > { %885 = vrot.lane.b32.xlu1 %v701_v45, %s1705_s20  ;;  %869 = vrot.lane.b32.xlu0 %v1821_v17, %s1705_s20  ;;  %v1065_v9 = vsel %vm1064_vm9, %v1048_v1, %v862_v41  ;;  %v974_v41 = vsel %vm962_vm3, %v1850_v28, %v2090_v23  ;;  %v703_v23 = vsel %vm470_vm0, %v700_v46, %v702_v58 }
  0xe1   : > { %v991_v13 = vsel %vm979_vm4, %v974_v41, %v2113_v7  ;;  %v972_v46 = vsel %vm962_vm3, %v1803_v6, %v2007_v35 }
  0xe2   : > { %v931_v22 = vpop.permute.xlu1 %930  ;;  %v915_v11 = vpop.permute.xlu0 %914  ;;  %v1008_v29 = vsel %vm996_vm5, %v991_v13, %v2139_v43 }
  0xe3   : > { %v1090_v49 = vsel %vm1081_vm10, %v1073_v21, %v931_v22  ;;  %v1082_v51 = vsel %vm1081_vm10, %v1065_v9, %v915_v11 }
  0xe4   : > { %680 = vrot.lane.b32.xlu1 %v2144_v39, %s1701_s16  ;;  %1587 = vmatprep.mubr.msk.f32.mxu1 %vm1109_vm11, %v1090_v49  ;;  %v989_v39 = vsel %vm979_vm4, %v972_v46, %v2031_v47  ;;  %v2581_v49 = vld [vmem:[#allocation7_spill] sm:$0xff] }
  0xe5   : > { %664 = vrot.lane.b32.xlu0 %v1803_v6, %s1701_s16  ;;  %1575 = vmatprep.mubr.msk.f32.mxu0 %vm1109_vm11, %v1082_v51  ;;  %v1006_v6 = vsel %vm996_vm5, %v989_v39, %v2049_v60  ;;  %s401_s16 = sadd.s32 %s1610_s15, %s1785_s7 }
  0xe6   : > { %v536_v59 = vpop.permute.xlu1 %535  ;;  %v520_v15 = vpop.permute.xlu0 %519  ;;  %v1023_v47 = vsel %vm1013_vm6, %v1006_v6, %v2077_v18 }
  0xe7   : > { %v1040_v42 = vsel %vm1030_vm7, %v1023_v47, %v2100_v62  ;;  %v975_v37 = vsel %vm962_vm3, %v1911_v52, %v536_v59 }
  0xe8   : > { %732 = vrot.lane.b32.xlu1 %v701_v45, %s1702_s17  ;;  %v1057_v60 = vsel %vm1047_vm8, %v1040_v42, %v2129_v5  ;;  %v755_v5 = vrot.slane %v2207_v3, 2 }
  0xe9   : > { %716 = vrot.lane.b32.xlu0 %v1821_v17, %s1702_s17  ;;  %v964_v17 = vsel %vm962_vm3, %v1794_v0, %v1999_v32  ;;  %v754_v0 = vsel %vm559_vm1, %v752_v27, %v753_v31  ;;  %v1074_v18 = vsel %vm1064_vm9, %v1057_v60, %v2187_v33 }
  0xea   : > { %v727_v4 = vpop.permute.xlu1 %726  ;;  %v711_v44 = vpop.permute.xlu0 %710  ;;  %v981_v40 = vsel %vm979_vm4, %v964_v17, %v2033_v48 }
  0xeb   : > { %v2242_v7 = vsel %vm1013_vm6, %v1008_v29, %v727_v4  ;;  %v2245_v8 = vsel %vm1013_vm6, %v1000_v25, %v711_v44  ;;  %v998_v32 = vsel %vm996_vm5, %v981_v40, %v2051_v61  ;;  %v2582_v29 = vld [vmem:[#allocation3_spill] sm:$0xff]  ;;  %v2583_v44 = vld [vmem:[#allocation4_spill] sm:$0xff] }
  0xec   : > { %887 = vrot.lane.b32.xlu1 %v703_v23, %s1705_s20  ;;  %v1015_v48 = vsel %vm1013_vm6, %v998_v32, %v2079_v19 }
  0xed   : > { %871 = vrot.lane.b32.xlu0 %v1818_v16, %s1705_s20  ;;  %v1032_v45 = vsel %vm1030_vm7, %v1015_v48, %v2102_v63 }
  0xee   : > { %v2269_v35 = vpop.permute.xlu1 %777  ;;  %v2271_v43 = vpop.permute.xlu0 %761  ;;  %v1049_v61 = vsel %vm1047_vm8, %v1032_v45, %v2131_v14  ;;  %v2585_v45 = vld [vmem:[#allocation6_spill] sm:$0xff] }
  0xef   : > { %v1066_v19 = vsel %vm1064_vm9, %v1049_v61, %v2189_v36  ;;  %v756_v36 = vsel %vm559_vm1, %v753_v31, %v755_v5 }
  0xf0   : > { %938 = vrot.lane.b32.xlu1 %v754_v0, %s1706_s11 }
  0xf1   : > { %922 = vrot.lane.b32.xlu0 %v1830_v20, %s1706_s11 }
  0xf2   : > { %v933_v62 = vpop.permute.xlu1 %932  ;;  %v917_v63 = vpop.permute.xlu0 %916 }
  0xf3   : > { %v1091_v2 = vsel %vm1081_vm10, %v1074_v18, %v933_v62  ;;  %v1083_v10 = vsel %vm1081_vm10, %v1066_v19, %v917_v63 }
  0xf4   : > { %734 = vrot.lane.b32.xlu1 %v703_v23, %s1702_s17  ;;  %1588 = vmatmul.mubr.msk.f32.vlgmr.msra.gmra.mxu1 %vm1109_vm11, %v1091_v2  ;;  %v1041_v2 = vsel %vm1030_vm7, %v2163_v34, %v2269_v35 }
  0xf5   : > { %718 = vrot.lane.b32.xlu0 %v1818_v16, %s1702_s17  ;;  %1576 = vmatmul.mubr.msk.f32.vlgmr.msra.gmra.mxu0 %vm1109_vm11, %v1083_v10  ;;  %v967_v16 = vsel %vm962_vm3, %v1914_v53, %v520_v15  ;;  %s1523_s17 = sshll.u32 %s401_s16, 3  ;;  %v1033_v10 = vsel %vm1030_vm7, %v2166_v55, %v2271_v43 }
  0xf6   : > { %v538_v14 = vpop.permute.xlu1 %537  ;;  %v522_v33 = vpop.permute.xlu0 %521  ;;  %s403_s13 = scalar_lea.vmem %s2557_s2, %s1523_s17 }
  0xf7   : > { %v443_v52 = vld [vmem:[%s403_s13] sm:$0xff]  ;;  %v444_v21 = vld [vmem:[%s403_s13 + $0x8] sm:$0xff]  ;;  %v976_v11 = vsel %vm962_vm3, %v1924_v54, %v538_v14  ;;  %v968_v51 = vsel %vm962_vm3, %v2581_v49, %v522_v33  ;;  %v445_v58 = vld [vmem:[%s403_s13 + $0x10] sm:$0x3] }
  0xf8   : > { %785 = vrot.lane.b32.xlu1 %v754_v0, %s1703_s18  ;;  %v856_v9 = vrot.slane %v443_v52, 1  ;;  %v857_v22 = vrot.slane %v444_v21, 1  ;;  %v859_v12 = vrot.slane %v445_v58, 1  ;;  %v909_v31 = vrot.slane %v443_v52, 2  ;;  %v2584_v0 = vld [vmem:[#allocation5_spill] sm:$0xff] }
  0xf9   : > { %769 = vrot.lane.b32.xlu0 %v1830_v20, %s1703_s18  ;;  %v910_v23 = vrot.slane %v444_v21, 2  ;;  %v912_v46 = vrot.slane %v445_v58, 2 }
  0xfa   : > { %v625_v38 = vpop.permute.xlu1 %624  ;;  %v609_v50 = vpop.permute.xlu0 %608  ;;  %v860_v25 = vsel %vm470_vm0, %v857_v22, %v859_v12 }
  0xfb   : > { %v992_v56 = vsel %vm979_vm4, %v975_v37, %v625_v38  ;;  %v984_v57 = vsel %vm979_vm4, %v967_v16, %v609_v50  ;;  %v911_v17 = vsel %vm559_vm1, %v909_v31, %v910_v23  ;;  %v913_v6 = vsel %vm559_vm1, %v910_v23, %v912_v46 }
  0xfc   : > { %940 = vrot.lane.b32.xlu1 %v756_v36, %s1706_s11 }
  0xfd   : > { %924 = vrot.lane.b32.xlu0 %v1837_v24, %s1706_s11 }
  0xfe   : > { %v2316_v20 = vpop.permute.xlu1 %779  ;;  %v2318_v1 = vpop.permute.xlu0 %763 }
 0x100   : > { %787 = vrot.lane.b32.xlu1 %v756_v36, %s1703_s18 }
 0x101   : > { %771 = vrot.lane.b32.xlu0 %v1837_v24, %s1703_s18  ;;  %s1524_s18 = sshll.u32 %s1681_s23, 4 }
 0x102   : > { %v828_v53 = vpop.permute.xlu1 %827  ;;  %v812_v3 = vpop.permute.xlu0 %811  ;;  %p409_p9 = scmp.lt.s32.totalorder %s1524_s18, 31 }
 0x103   : > { %v1058_v5 = vsel %vm1047_vm8, %v1041_v2, %v828_v53  ;;  %v1050_v14 = vsel %vm1047_vm8, %v1033_v10, %v812_v3  ;;  %v1042_v3 = vsel %vm1030_vm7, %v2242_v7, %v2316_v20  ;;  %v2586_v20 = vld [vmem:[#allocation8_spill] sm:$0xff] }
 0x104   : > { %835 = vrot.lane.b32.xlu1 %v443_v52, %s1704_s19  ;;  %s2607_s18 = smov (!%p409_p9, %s1524_s18), 31 }
 0x105   : > { %819 = vrot.lane.b32.xlu0 %v1844_v26, %s1704_s19  ;;  %v858_v26 = vsel %vm470_vm0, %v856_v9, %v857_v22 }
 0x106   : > { %v627_v59 = vpop.permute.xlu1 %626  ;;  %v611_v24 = vpop.permute.xlu0 %610 }
 0x107   : > { %v993_v15 = vsel %vm979_vm4, %v976_v11, %v627_v59  ;;  %v985_v41 = vsel %vm979_vm4, %v968_v51, %v611_v24 }
 0x108   : > { %837 = vrot.lane.b32.xlu1 %v444_v21, %s1704_s19  ;;  %v1034_v21 = vsel %vm1030_vm7, %v2245_v8, %v2318_v1 }
 0x109   : > { %821 = vrot.lane.b32.xlu0 %v1850_v28, %s1704_s19  ;;  %s1307_s19 = sld [smem:[#allocation2]] }
 0x10a   : > { %v675_v27 = vpop.permute.xlu1 %674  ;;  %v659_v54 = vpop.permute.xlu0 %658 }
 0x10b   : > { %v1009_v13 = vsel %vm996_vm5, %v992_v56, %v675_v27  ;;  %v1001_v30 = vsel %vm996_vm5, %v984_v57, %v659_v54 }
 0x10c   : > { %889 = vrot.lane.b32.xlu1 %v858_v26, %s1705_s20 }
 0x10d   : > { %873 = vrot.lane.b32.xlu0 %v2582_v29, %s1705_s20 }
 0x10e   : > { %v830_v4 = vpop.permute.xlu1 %829  ;;  %v814_v28 = vpop.permute.xlu0 %813 }
 0x10f   : > { %v1059_v9 = vsel %vm1047_vm8, %v1042_v3, %v830_v4  ;;  %v1051_v22 = vsel %vm1047_vm8, %v1034_v21, %v814_v28 }
 0x110   : > { %891 = vrot.lane.b32.xlu1 %v860_v25, %s1705_s20 }
 0x111   : > { %875 = vrot.lane.b32.xlu0 %v2583_v44, %s1705_s20  ;;  %s1525_s20 = sshll.u32 %s2601_s24, 5 }
 0x112   : > { %v882_v39 = vpop.permute.xlu1 %881  ;;  %v866_v40 = vpop.permute.xlu0 %865 }
 0x113   : > { %v1075_v33 = vsel %vm1064_vm9, %v1058_v5, %v882_v39  ;;  %v1067_v36 = vsel %vm1064_vm9, %v1050_v14, %v866_v40 }
 0x114   : > { %942 = vrot.lane.b32.xlu1 %v911_v17, %s1706_s11 }
 0x115   : > { %926 = vrot.lane.b32.xlu0 %v2584_v0, %s1706_s11 }
 0x116   : > { %v677_v32 = vpop.permute.xlu1 %676  ;;  %v661_v47 = vpop.permute.xlu0 %660 }
 0x117   : > { %v1010_v48 = vsel %vm996_vm5, %v993_v15, %v677_v32  ;;  %v1002_v42 = vsel %vm996_vm5, %v985_v41, %v661_v47  ;;  %v2587_v15 = vld [vmem:[#allocation9_spill] sm:$0xff] }
 0x118   : > { %944 = vrot.lane.b32.xlu1 %v913_v6, %s1706_s11 }
 0x119   : > { %928 = vrot.lane.b32.xlu0 %v2585_v45, %s1706_s11  ;;  %s412_s11 = sadd.s32 %s1525_s20, %s2607_s18 }
 0x11a   : > { %v729_v60 = vpop.permute.xlu1 %728  ;;  %v713_v61 = vpop.permute.xlu0 %712  ;;  %s1526_s8 = sshll.u32 %s412_s11, 3 }
 0x11b   : > { %v2359_v18 = vsel %vm1013_vm6, %v1009_v13, %v729_v60  ;;  %v2362_v19 = vsel %vm1013_vm6, %v1001_v30, %v713_v61  ;;  %s2476_s24 = scalar_lea.vmem %s2561_s6, %s1526_s8 }
 0x11e   : > { %v884_v62 = vpop.permute.xlu1 %883  ;;  %v868_v63 = vpop.permute.xlu0 %867 }
 0x11f   : > { %v1076_v11 = vsel %vm1064_vm9, %v1059_v9, %v884_v62  ;;  %v1068_v49 = vsel %vm1064_vm9, %v1051_v22, %v868_v63 }
 0x122   : > { %v935_v37 = vpop.permute.xlu1 %934  ;;  %v919_v16 = vpop.permute.xlu0 %918 }
 0x123   : > { %v1092_v38 = vsel %vm1081_vm10, %v1075_v33, %v935_v37  ;;  %v1084_v50 = vsel %vm1081_vm10, %v1067_v36, %v919_v16 }
 0x124   : > { %1578 = vmatprep.mubr.msk.f32.mxu0 %vm1109_vm11, %v1084_v50  ;;  %1590 = vmatprep.mubr.msk.f32.mxu1 %vm1109_vm11, %v1092_v38 }
 0x126   : > { %v540_v34 = vpop.permute.xlu1 %539  ;;  %v524_v55 = vpop.permute.xlu0 %523 }
 0x127   : > { %v977_v1 = vsel %vm962_vm3, %v2586_v20, %v540_v34  ;;  %v969_v41 = vsel %vm962_vm3, %v2587_v15, %v524_v55 }
 0x12a   : > { %v731_v35 = vpop.permute.xlu1 %730  ;;  %v715_v43 = vpop.permute.xlu0 %714 }
 0x12b   : > { %v1027_v56 = vsel %vm1013_vm6, %v1010_v48, %v731_v35  ;;  %v1019_v57 = vsel %vm1013_vm6, %v1002_v42, %v715_v43 }
 0x12e   : > { %v782_v52 = vpop.permute.xlu1 %781  ;;  %v766_v53 = vpop.permute.xlu0 %765 }
 0x12f   : > { %v1043_v42 = vsel %vm1030_vm7, %v2359_v18, %v782_v52  ;;  %v1035_v45 = vsel %vm1030_vm7, %v2362_v19, %v766_v53 }
 0x132   : > { %v937_v51 = vpop.permute.xlu1 %936  ;;  %v921_v58 = vpop.permute.xlu0 %920 }
 0x133   : > { %v1093_v59 = vsel %vm1081_vm10, %v1076_v11, %v937_v51  ;;  %v1085_v24 = vsel %vm1081_vm10, %v1068_v49, %v921_v58 }
 0x134   : > { %1579 = vmatmul.mubr.msk.f32.gmra.mxu0 %vm1109_vm11, %v1085_v24  ;;  %1591 = vmatmul.mubr.msk.f32.gmra.mxu1 %vm1109_vm11, %v1093_v59 }
 0x136   : > { %v2394_v7 = vpop.permute.xlu1 %541  ;;  %v2396_v8 = vpop.permute.xlu0 %525 }
 0x13a   : > { %v629_v26 = vpop.permute.xlu1 %628  ;;  %v613_v12 = vpop.permute.xlu0 %612 }
 0x13b   : > { %v994_v27 = vsel %vm979_vm4, %v977_v1, %v629_v26  ;;  %v986_v54 = vsel %vm979_vm4, %v969_v41, %v613_v12  ;;  %v2588_v1 = vld [vmem:[#allocation10_spill] sm:$0xff]  ;;  %v2589_v12 = vld [vmem:[#allocation11_spill] sm:$0xff] }
 0x13c   : > { %v978_v15 = vsel %vm962_vm3, %v2588_v1, %v2394_v7 }
 0x13e   : > { %v784_v13 = vpop.permute.xlu1 %783  ;;  %v768_v30 = vpop.permute.xlu0 %767 }
 0x13f   : > { %v1044_v37 = vsel %vm1030_vm7, %v1027_v56, %v784_v13  ;;  %v1036_v16 = vsel %vm1030_vm7, %v1019_v57, %v768_v30  ;;  %v970_v13 = vsel %vm962_vm3, %v2589_v12, %v2396_v8 }
 0x142   : > { %v832_v31 = vpop.permute.xlu1 %831  ;;  %v816_v23 = vpop.permute.xlu0 %815 }
 0x143   : > { %v1060_v60 = vsel %vm1047_vm8, %v1043_v42, %v832_v31  ;;  %v1052_v61 = vsel %vm1047_vm8, %v1035_v45, %v816_v23 }
 0x146   : > { %v631_v29 = vpop.permute.xlu1 %630  ;;  %v615_v25 = vpop.permute.xlu0 %614 }
 0x147   : > { %v987_v31 = vsel %vm979_vm4, %v970_v13, %v615_v25 }
 0x14a   : > { %v679_v4 = vpop.permute.xlu1 %678  ;;  %v663_v28 = vpop.permute.xlu0 %662 }
 0x14b   : > { %v1011_v51 = vsel %vm996_vm5, %v994_v27, %v679_v4  ;;  %v1003_v59 = vsel %vm996_vm5, %v986_v54, %v663_v28  ;;  %v995_v27 = vsel %vm979_vm4, %v978_v15, %v631_v29 }
 0x14e   : > { %v834_v44 = vpop.permute.xlu1 %833  ;;  %v818_v17 = vpop.permute.xlu0 %817 }
 0x14f   : > { %v1061_v38 = vsel %vm1047_vm8, %v1044_v37, %v834_v44  ;;  %v1053_v50 = vsel %vm1047_vm8, %v1036_v16, %v818_v17 }
 0x152   : > { %v886_v46 = vpop.permute.xlu1 %885  ;;  %v870_v39 = vpop.permute.xlu0 %869 }
 0x153   : > { %v1077_v62 = vsel %vm1064_vm9, %v1060_v60, %v886_v46  ;;  %v1069_v2 = vsel %vm1064_vm9, %v1052_v61, %v870_v39 }
 0x156   : > { %v681_v40 = vpop.permute.xlu1 %680 }
 0x157   : > { %v665_v0 = vpop.permute.xlu0 %664  ;;  %v1012_v23 = vsel %vm996_vm5, %v995_v27, %v681_v40 }
 0x158   : > { %v1004_v44 = vsel %vm996_vm5, %v987_v31, %v665_v0 }
 0x15a   : > { %v733_v6 = vpop.permute.xlu1 %732 }
 0x15b   : > { %v717_v32 = vpop.permute.xlu0 %716  ;;  %v1028_v24 = vsel %vm1013_vm6, %v1011_v51, %v733_v6 }
 0x15c   : > { %v1020_v41 = vsel %vm1013_vm6, %v1003_v59, %v717_v32 }
 0x15e   : > { %v888_v47 = vpop.permute.xlu1 %887 }
 0x15f   : > { %v872_v48 = vpop.permute.xlu0 %871  ;;  %v1078_v34 = vsel %vm1064_vm9, %v1061_v38, %v888_v47 }
 0x160   : > { %v1070_v35 = vsel %vm1064_vm9, %v1053_v50, %v872_v48 }
 0x162   : > { %v939_v63 = vpop.permute.xlu1 %938 }
 0x163   : > { %v1094_v10 = vsel %vm1081_vm10, %v1077_v62, %v939_v63  ;;  %v923_v5 = vpop.permute.xlu0 %922  ;;  %v2467_v62 = vld [vmem:[%s2559_s4] ss:$0 sm:$0xff]  ;;  %v2469_v63 = vstv %s1307_s19 }
 0x164   : > { %v1086_v14 = vsel %vm1081_vm10, %v1069_v2, %v923_v5  ;;  %1593 = vmatprep.mubr.msk.f32.mxu1 %vm1109_vm11, %v1094_v10 }
 0x165   : > { %1581 = vmatprep.mubr.msk.f32.mxu0 %vm1109_vm11, %v1086_v14 }
 0x166   : > { %v735_v18 = vpop.permute.xlu1 %734 }
 0x167   : > { %v719_v19 = vpop.permute.xlu0 %718  ;;  %v1029_v17 = vsel %vm1013_vm6, %v1012_v23, %v735_v18 }
 0x168   : > { %v1021_v39 = vsel %vm1013_vm6, %v1004_v44, %v719_v19 }
 0x16a   : > { %v786_v33 = vpop.permute.xlu1 %785 }
 0x16b   : > { %v770_v36 = vpop.permute.xlu0 %769  ;;  %v1045_v26 = vsel %vm1030_vm7, %v1028_v24, %v786_v33 }
 0x16c   : > { %v1037_v30 = vsel %vm1030_vm7, %v1020_v41, %v770_v36 }
 0x16e   : > { %v941_v55 = vpop.permute.xlu1 %940 }
 0x16f   : > { %v1095_v43 = vsel %vm1081_vm10, %v1078_v34, %v941_v55  ;;  %v925_v52 = vpop.permute.xlu0 %924 }
 0x170   : > { %v1087_v53 = vsel %vm1081_vm10, %v1070_v35, %v925_v52  ;;  %1594 = vmatmul.mubr.msk.f32.gmra.mxu1 %vm1109_vm11, %v1095_v43 }
 0x171   : > { %1582 = vmatmul.mubr.msk.f32.gmra.mxu0 %vm1109_vm11, %v1087_v53 }
 0x172   : > { %v788_v56 = vpop.permute.xlu1 %787 }
 0x173   : > { %v772_v57 = vpop.permute.xlu0 %771  ;;  %v1046_v25 = vsel %vm1030_vm7, %v1029_v17, %v788_v56 }
 0x174   : > { %v1038_v6 = vsel %vm1030_vm7, %v1021_v39, %v772_v57 }
 0x176   : > { %v836_v3 = vpop.permute.xlu1 %835 }
 0x177   : > { %v820_v21 = vpop.permute.xlu0 %819  ;;  %v1062_v54 = vsel %vm1047_vm8, %v1045_v26, %v836_v3 }
 0x178   : > { %v1054_v7 = vsel %vm1047_vm8, %v1037_v30, %v820_v21 }
 0x17a   : > { %v838_v9 = vpop.permute.xlu1 %837 }
 0x17b   : > { %v822_v22 = vpop.permute.xlu0 %821  ;;  %v1063_v0 = vsel %vm1047_vm8, %v1046_v25, %v838_v9 }
 0x17c   : > { %v1055_v32 = vsel %vm1047_vm8, %v1038_v6, %v822_v22 }
 0x17e   : > { %v890_v11 = vpop.permute.xlu1 %889 }
 0x17f   : > { %v874_v49 = vpop.permute.xlu0 %873  ;;  %v1079_v4 = vsel %vm1064_vm9, %v1062_v54, %v890_v11 }
 0x180   : > { %v1071_v8 = vsel %vm1064_vm9, %v1054_v7, %v874_v49 }
 0x182   : > { %v892_v58 = vpop.permute.xlu1 %891 }
 0x183   : > { %v876_v20 = vpop.permute.xlu0 %875  ;;  %v1080_v47 = vsel %vm1064_vm9, %v1063_v0, %v892_v58 }
 0x184   : > { %v1072_v42 = vsel %vm1064_vm9, %v1055_v32, %v876_v20 }
 0x186   : > { %v943_v28 = vpop.permute.xlu1 %942 }
 0x187   : > { %v1096_v29 = vsel %vm1081_vm10, %v1079_v4, %v943_v28  ;;  %v927_v46 = vpop.permute.xlu0 %926 }
 0x188   : > { %v1088_v40 = vsel %vm1081_vm10, %v1071_v8, %v927_v46  ;;  %1596 = vmatprep.mubr.msk.f32.mxu1 %vm1109_vm11, %v1096_v29 }
 0x189   : > { %1584 = vmatprep.mubr.msk.f32.mxu0 %vm1109_vm11, %v1088_v40 }
 0x18a   : > { %v945_v48 = vpop.permute.xlu1 %944 }
 0x18b   : > { %v1097_v45 = vsel %vm1081_vm10, %v1080_v47, %v945_v48  ;;  %v929_v60 = vpop.permute.xlu0 %928 }
 0x18c   : > { %v1089_v61 = vsel %vm1081_vm10, %v1072_v42, %v929_v60  ;;  %1597 = vmatmul.mubr.msk.f32.gmra.mxu1 %vm1109_vm11, %v1097_v45 }
 0x18d   : > { %1585 = vmatmul.mubr.msk.f32.gmra.mxu0 %vm1109_vm11, %v1089_v61 }
 0x1b4   : > { %v1589_v2 = vpop.f32.mrf.mxu1 }
 0x1b5   : > { %v1577_v10 = vpop.f32.mrf.mxu0  ;;  %v1274_v5 = vadd.f32 %v1589_v2, %v2467_v62 }
 0x1b6   : > { %v1234_v14 = vadd.f32 %v1577_v10, %v2467_v62  ;;  %v1268_v18 = vpop.f32.mrf.mxu1 }
 0x1b7   : > { %vm1317_vm13 = vcmp.ge.f32.partialorder %v1274_v5, 0.0  ;;  %v1334_v19 = vmul.f32 %v2469_v63, %v1274_v5  ;;  %v1228_v33 = vpop.f32.mrf.mxu0  ;;  %v1269_v36 = vadd.f32 %v2467_v62, %v1268_v18 }
 0x1b8   : > { %vm1309_vm14 = vcmp.ge.f32.partialorder %v1234_v14, 0.0  ;;  %v1326_v37 = vmul.f32 %v2469_v63, %v1234_v14  ;;  %v1229_v16 = vadd.f32 %v2467_v62, %v1228_v33 }
 0x1b9   : > { %v1350_v38 = vsel %vm1317_vm13, %v1274_v5, %v1334_v19  ;;  %vm1316_vm15 = vcmp.ge.f32.partialorder %v1269_v36, 0.0  ;;  %v1333_v50 = vmul.f32 %v2469_v63, %v1269_v36 }
 0x1ba   : > { %v1342_v34 = vsel %vm1309_vm14, %v1234_v14, %v1326_v37  ;;  %1367 = vst.msk [vmem:[%s2476_s24 + $0x48] sm:$0xff] %vm1357_vm12, %v1350_v38  ;;  %vm1308_vm0 = vcmp.ge.f32.partialorder %v1229_v16, 0.0  ;;  %v1325_v55 = vmul.f32 %v2469_v63, %v1229_v16 }
 0x1bb   : > { %1359 = vst.msk [vmem:[%s2476_s24 + $0x8] sm:$0xff] %vm1357_vm12, %v1342_v34  ;;  %v1349_v35 = vsel %vm1316_vm15, %v1269_v36, %v1333_v50 }
 0x1bc   : > { %v1341_v43 = vsel %vm1308_vm0, %v1229_v16, %v1325_v55  ;;  %1366 = vst.msk [vmem:[%s2476_s24 + $0x40] sm:$0xff] %vm1357_vm12, %v1349_v35 }
 0x1bd   : > { %1358 = vst.msk [vmem:[%s2476_s24] sm:$0xff] %vm1357_vm12, %v1341_v43 }
 0x1f4   : > { %v1580_v52 = vpop.f32.mrf.mxu0  ;;  %v1592_v53 = vpop.f32.mrf.mxu1 }
 0x1f5   : > { %v1244_v56 = vadd.f32 %v1580_v52, %v2467_v62  ;;  %v1284_v57 = vadd.f32 %v1592_v53, %v2467_v62 }
 0x1f6   : > { %v1238_v3 = vpop.f32.mrf.mxu0  ;;  %v1278_v21 = vpop.f32.mrf.mxu1 }
 0x1f7   : > { %vm1311_vm1 = vcmp.ge.f32.partialorder %v1244_v56, 0.0  ;;  %v1328_v9 = vmul.f32 %v2469_v63, %v1244_v56  ;;  %vm1319_vm2 = vcmp.ge.f32.partialorder %v1284_v57, 0.0  ;;  %v1336_v22 = vmul.f32 %v2469_v63, %v1284_v57 }
 0x1f8   : > { %v1239_v11 = vadd.f32 %v2467_v62, %v1238_v3  ;;  %v1279_v49 = vadd.f32 %v2467_v62, %v1278_v21 }
 0x1f9   : > { %v1344_v51 = vsel %vm1311_vm1, %v1244_v56, %v1328_v9  ;;  %v1352_v58 = vsel %vm1319_vm2, %v1284_v57, %v1336_v22 }
 0x1fa   : > { %1361 = vst.msk [vmem:[%s2476_s24 + $0x18] sm:$0xff] %vm1357_vm12, %v1344_v51  ;;  %1369 = vst.msk [vmem:[%s2476_s24 + $0x58] sm:$0xff] %vm1357_vm12, %v1352_v58  ;;  %vm1310_vm3 = vcmp.ge.f32.partialorder %v1239_v11, 0.0  ;;  %v1327_v59 = vmul.f32 %v2469_v63, %v1239_v11  ;;  %vm1318_vm4 = vcmp.ge.f32.partialorder %v1279_v49, 0.0  ;;  %v1335_v24 = vmul.f32 %v2469_v63, %v1279_v49 }
 0x1fc   : > { %v1343_v20 = vsel %vm1310_vm3, %v1239_v11, %v1327_v59  ;;  %v1351_v1 = vsel %vm1318_vm4, %v1279_v49, %v1335_v24 }
 0x1fd   : > { %1360 = vst.msk [vmem:[%s2476_s24 + $0x10] sm:$0xff] %vm1357_vm12, %v1343_v20  ;;  %1368 = vst.msk [vmem:[%s2476_s24 + $0x50] sm:$0xff] %vm1357_vm12, %v1351_v1 }
 0x230   : > { %v1595_v15 = vpop.f32.mrf.mxu1 }
 0x231   : > { %v1583_v41 = vpop.f32.mrf.mxu0  ;;  %v1294_v26 = vadd.f32 %v1595_v15, %v2467_v62 }
 0x232   : > { %v1254_v12 = vadd.f32 %v1583_v41, %v2467_v62  ;;  %v1288_v13 = vpop.f32.mrf.mxu1 }
 0x233   : > { %vm1321_vm5 = vcmp.ge.f32.partialorder %v1294_v26, 0.0  ;;  %v1338_v27 = vmul.f32 %v2469_v63, %v1294_v26  ;;  %v1248_v30 = vpop.f32.mrf.mxu0  ;;  %v1289_v54 = vadd.f32 %v2467_v62, %v1288_v13 }
 0x234   : > { %vm1313_vm6 = vcmp.ge.f32.partialorder %v1254_v12, 0.0  ;;  %v1330_v31 = vmul.f32 %v2469_v63, %v1254_v12  ;;  %v1249_v23 = vadd.f32 %v2467_v62, %v1248_v30 }
 0x235   : > { %v1354_v7 = vsel %vm1321_vm5, %v1294_v26, %v1338_v27  ;;  %vm1320_vm7 = vcmp.ge.f32.partialorder %v1289_v54, 0.0  ;;  %v1337_v4 = vmul.f32 %v2469_v63, %v1289_v54 }
 0x236   : > { %v1346_v28 = vsel %vm1313_vm6, %v1254_v12, %v1330_v31  ;;  %1371 = vst.msk [vmem:[%s2476_s24 + $0x68] sm:$0xff] %vm1357_vm12, %v1354_v7  ;;  %vm1312_vm8 = vcmp.ge.f32.partialorder %v1249_v23, 0.0  ;;  %v1329_v44 = vmul.f32 %v2469_v63, %v1249_v23 }
 0x237   : > { %1363 = vst.msk [vmem:[%s2476_s24 + $0x28] sm:$0xff] %vm1357_vm12, %v1346_v28  ;;  %v1353_v17 = vsel %vm1320_vm7, %v1289_v54, %v1337_v4 }
 0x238   : > { %v1345_v8 = vsel %vm1312_vm8, %v1249_v23, %v1329_v44  ;;  %1370 = vst.msk [vmem:[%s2476_s24 + $0x60] sm:$0xff] %vm1357_vm12, %v1353_v17 }
 0x239   : > { %1362 = vst.msk [vmem:[%s2476_s24 + $0x20] sm:$0xff] %vm1357_vm12, %v1345_v8 }
 0x24c   : > { %v1598_v29 = vpop.f32.mrf.mxu1 }
 0x24d   : > { %v1586_v46 = vpop.f32.mrf.mxu0  ;;  %v1304_v39 = vadd.f32 %v1598_v29, %v2467_v62 }
 0x24e   : > { %v1264_v25 = vadd.f32 %v1586_v46, %v2467_v62  ;;  %v1298_v40 = vpop.f32.mrf.mxu1 }
 0x24f   : > { %vm1323_vm9 = vcmp.ge.f32.partialorder %v1304_v39, 0.0  ;;  %v1340_v6 = vmul.f32 %v2469_v63, %v1304_v39  ;;  %v1258_v0 = vpop.f32.mrf.mxu0  ;;  %v1299_v32 = vadd.f32 %v2467_v62, %v1298_v40 }
 0x250   : > { %vm1315_vm10 = vcmp.ge.f32.partialorder %v1264_v25, 0.0  ;;  %v1332_v47 = vmul.f32 %v2469_v63, %v1264_v25  ;;  %v1259_v48 = vadd.f32 %v2467_v62, %v1258_v0 }
 0x251   : > { %v1356_v42 = vsel %vm1323_vm9, %v1304_v39, %v1340_v6  ;;  %vm1322_vm11 = vcmp.ge.f32.partialorder %v1299_v32, 0.0  ;;  %v1339_v45 = vmul.f32 %v2469_v63, %v1299_v32 }
 0x252   : > { %v1348_v60 = vsel %vm1315_vm10, %v1264_v25, %v1332_v47  ;;  %1373 = vst.msk [vmem:[%s2476_s24 + $0x78] sm:$0xff] %vm1357_vm12, %v1356_v42  ;;  %vm1314_vm13 = vcmp.ge.f32.partialorder %v1259_v48, 0.0  ;;  %v1331_v61 = vmul.f32 %v2469_v63, %v1259_v48 }
 0x253   : > { %1365 = vst.msk [vmem:[%s2476_s24 + $0x38] sm:$0xff] %vm1357_vm12, %v1348_v60  ;;  %v1355_v2 = vsel %vm1322_vm11, %v1299_v32, %v1339_v45 }
 0x254   : > { %v1347_v10 = vsel %vm1314_vm13, %v1259_v48, %v1331_v61  ;;  %1372 = vst.msk [vmem:[%s2476_s24 + $0x70] sm:$0xff] %vm1357_vm12, %v1355_v2 }
 0x255   : > { %1364 = vst.msk [vmem:[%s2476_s24 + $0x30] sm:$0xff] %vm1357_vm12, %v1347_v10 }
 0x256 PF: > { %s17_s27 = sadd.s32 1, %s1697_s27   ;;  %s2590_s23 = smov %s1689_s25 }
 0x257   : > { %p14_p10 = scmp.ge.s32.totalorder %s17_s27, 6   ;;  %s2591_s24 = smov %s1693_s26 }
 0x258   : > { %s2592_s25 = smov %s2595_s5  ;;  %s2593_s26 = smov %s2599_s28 }
 0x259   :  { %16 = sbr.rel (!%p14_p10) target bundleno = 3 (0x3), region = 80 }

</bundles_post_ra>
